<compile_context>
chip_gen: v7x
topology: tpu7x:2x2x1
jax: 0.10.0
libtpu: 0.0.40
codegen_flags: <defaults>
</compile_context>

<pallas_src>
import math

import jax
import jax.numpy as jnp
from jax.experimental import pallas as pl
from jax.experimental.pallas import tpu as pltpu


def _build_pe(d_model: int, max_len: int = 5000, dtype=jnp.float32) -> jnp.ndarray:
    """Sinusoidal positional-encoding buffer, shape (1, d_model, max_len)."""
    position = jnp.arange(max_len, dtype=jnp.float32)[:, None]               # (max_len, 1)
    div_term = jnp.exp(
        jnp.arange(0, d_model, 2, dtype=jnp.float32) * (-math.log(10000.0) / d_model)
    )                                                                         # (ceil(d/2),)
    pe = jnp.zeros((max_len, d_model), dtype=jnp.float32)
    pe = pe.at[:, 0::2].set(jnp.sin(position * div_term))
    pe = pe.at[:, 1::2].set(jnp.cos(position * div_term[: d_model // 2]))     # odd d_model safe
    # unsqueeze(0).transpose(1, 2) -> (1, d_model, max_len)
    return pe.T[None, :, :].astype(dtype)


def _add_pe_kernel(x_ref, pe_ref, o_ref):
    # x_ref / o_ref: (b_tile, D, l_tile); pe_ref: (1, D, l_tile) -> broadcast over batch.
    o_ref[...] = (x_ref[...] + pe_ref[...]).astype(o_ref.dtype)


def _round_up(x: int, m: int) -> int:
    return -(-x // m) * m


def _vmem_capacity_bytes() -> int:
    try:
        return int(pltpu.get_tpu_info().vmem_capacity_bytes)
    except Exception:
        return 64 << 20  # conservative fallback: v7x per-TensorCore VMEM


def _choose_tiles(B: int, D: int, L: int, itemsize: int, target_block_bytes: int):
    """Pick (b_tile, l_tile): lane tile in 128-multiples up to the byte budget,
    then fill the remaining budget with batch rows."""
    slab_128 = max(D * 128 * itemsize, 1)                       # one (1, D, 128) lane group
    max_l_tile = max(128, (target_block_bytes // slab_128) * 128)
    l_tile = max(128, min(_round_up(L, 128), max_l_tile))       # multiple of 128
    block_row_bytes = max(D * l_tile * itemsize, 1)             # one (1, D, l_tile) slab
    b_tile = max(1, min(B, target_block_bytes // block_row_bytes))
    return int(b_tile), int(l_tile)


def _ensure_min_steps(B: int, L: int, b_tile: int, l_tile: int, min_steps: int = 4):
    """If the array spans multiple blocks but yields only 2-3 grid steps, shrink tiles so
    the pipeline has enough steps to overlap DMAs (and both v7x TCs get work)."""
    def steps(bt, lt):
        return pl.cdiv(B, bt) * pl.cdiv(L, lt)

    if steps(b_tile, l_tile) <= 1:       # whole problem fits in one block: leave it alone
        return b_tile, l_tile
    while steps(b_tile, l_tile) < min_steps:
        if l_tile > 128:
            l_tile = max(128, (l_tile // 2 // 128) * 128)
        elif b_tile > 1:
            b_tile = max(1, b_tile // 2)
        else:
            break
    return b_tile, l_tile


def positional_encoding(x: jnp.ndarray, pe: jnp.ndarray) -> jnp.ndarray:
    """x: (B, D, L); pe: (1, D, max_len). Returns x + pe[:, :, :L] (in x.dtype)."""
    B, D, L = x.shape
    _, D_pe, max_len = pe.shape
    assert D == D_pe, f"d_model mismatch: x has {D}, pe has {D_pe}"
    assert L <= max_len, f"seq_len {L} exceeds max_len {max_len}"
    assert max_len >= 128, "pe buffer must cover at least one 128-lane tile"

    if pe.dtype != x.dtype:
        # Fallback only: prefer building/caching pe in the model dtype once at init
        # (done in __main__) so no per-call (1, D, max_len) HBM convert copy is made.
        pe = pe.astype(x.dtype)

    itemsize = jnp.dtype(x.dtype).itemsize
    vmem_cap = _vmem_capacity_bytes()
    # 3 streams (x, pe, out) x 2 pipeline buffers must fit comfortably in scoped VMEM.
    target_block_bytes = int(min(8 << 20, max(2 << 20, vmem_cap // 12)))

    b_tile, l_tile = _choose_tiles(B, D, L, itemsize, target_block_bytes)
    b_tile, l_tile = _ensure_min_steps(B, L, b_tile, l_tile)

    n_l = pl.cdiv(L, l_tile)
    n_b = pl.cdiv(B, b_tile)

    # Double-buffered x + out + pe, plus headroom; never above ~3/4 of physical VMEM.
    needed = 2 * (2 * b_tile + 1) * D * l_tile * itemsize
    vmem_limit = int(min(vmem_cap * 3 // 4, max(32 << 20, needed + (8 << 20))))

    cost = pl.CostEstimate(
        flops=B * D * L,
        transcendentals=0,
        bytes_accessed=(2 * B + 1) * D * L * itemsize,  # read x + pe, write out
    )

    return pl.pallas_call(
        _add_pe_kernel,
        out_shape=jax.ShapeDtypeStruct((B, D, L), x.dtype),
        grid_spec=pltpu.PrefetchScalarGridSpec(
            num_scalar_prefetch=0,
            # Batch innermost: pe's block index is constant across consecutive steps,
            # so its DMA is issued once per L-tile, not once per (batch-tile x L-tile).
            grid=(n_l, n_b),
            in_specs=[
                pl.BlockSpec((b_tile, D, l_tile), lambda l, b: (b, 0, l)),  # x
                pl.BlockSpec((1, D, l_tile), lambda l, b: (0, 0, l)),       # pe (batch-invariant)
            ],
            out_specs=pl.BlockSpec((b_tile, D, l_tile), lambda l, b: (b, 0, l)),
        ),
        compiler_params=pltpu.CompilerParams(
            # Pure elementwise broadcast add, no reduction: every axis independent
            # (lets v7x's two TensorCores split the grid).
            dimension_semantics=("parallel", "parallel"),
            vmem_limit_bytes=vmem_limit,
        ),
        cost_estimate=cost,
    )(x, pe)


if __name__ == "__main__":
    # Small shapes consistent with the forward: x is (batch, d_model, seq_len).
    B, D, MAX_LEN = 2, 32, 512
    x_dtype = jnp.float32
    key = jax.random.PRNGKey(0)

    # Build the pe buffer once in the model dtype (cast hoisted out of the call path).
    pe = _build_pe(d_model=D, max_len=MAX_LEN, dtype=x_dtype)

    # Lane-aligned L and a ragged L (exercises the masked partial last tile).
    for L in (128, 200):
        x = jax.random.normal(jax.random.fold_in(key, L), (B, D, L), dtype=x_dtype)
        out = positional_encoding(x, pe)
        jax.block_until_ready(out)

        ref = x + pe[:, :, :L]
        assert out.shape == (B, D, L)
        assert jnp.allclose(out, ref, atol=1e-6), f"mismatch vs reference at L={L}"

    print("KERNEL_OK")
</pallas_src>

<mosaic_0001>
module attributes {stable_mosaic.version = 11 : i64} {
  func.func @_add_pe_kernel(%arg0: i32, %arg1: i32, %arg2: memref<2x32x128xf32, #tpu.memory_space<vmem>>, %arg3: memref<1x32x128xf32, #tpu.memory_space<vmem>>, %arg4: memref<2x32x128xf32, #tpu.memory_space<vmem>>) attributes {dimension_semantics = [#tpu.dimension_semantics<parallel>, #tpu.dimension_semantics<parallel>], iteration_bounds = array<i64: 1, 1>, scalar_prefetch = 0 : i64, scratch_operands = 0 : i64, tpu.core_type = #tpu.core_type<tc>, window_params = [{transform_indices = @transform_0, window_bounds = array<i64: 2, 32, 128>}, {transform_indices = @transform_1, window_bounds = array<i64: 1, 32, 128>}, {transform_indices = @transform_2, window_bounds = array<i64: 2, 32, 128>}]} {
    %c0 = arith.constant 0 : index
    %c0_0 = arith.constant 0 : index
    %c0_1 = arith.constant 0 : index
    %0 = vector.load %arg2[%c0, %c0_0, %c0_1] : memref<2x32x128xf32, #tpu.memory_space<vmem>>, vector<2x32x128xf32>
    %c0_2 = arith.constant 0 : index
    %c0_3 = arith.constant 0 : index
    %c0_4 = arith.constant 0 : index
    %1 = vector.load %arg3[%c0_2, %c0_3, %c0_4] : memref<1x32x128xf32, #tpu.memory_space<vmem>>, vector<1x32x128xf32>
    %2 = vector.broadcast %1 : vector<1x32x128xf32> to vector<2x32x128xf32>
    %3 = arith.addf %0, %2 : vector<2x32x128xf32>
    %c0_5 = arith.constant 0 : index
    %c0_6 = arith.constant 0 : index
    %c0_7 = arith.constant 0 : index
    %4 = vector.load %arg4[%c0_5, %c0_6, %c0_7] : memref<2x32x128xf32, #tpu.memory_space<vmem>>, vector<2x32x128xf32>
    tpu.vector_store %arg4[%c0_5, %c0_6, %c0_7], %3 {strides = array<i32>} : memref<2x32x128xf32, #tpu.memory_space<vmem>>, vector<2x32x128xf32>,
    return
  }
  func.func @transform_0(%arg0: i32, %arg1: i32) -> (i32, i32, i32) {
    %c0_i32 = arith.constant 0 : i32
    %c0_i32_0 = arith.constant 0 : i32
    return %arg1, %c0_i32, %arg0 : i32, i32, i32
  }
  func.func @transform_1(%arg0: i32, %arg1: i32) -> (i32, i32, i32) {
    %c0_i32 = arith.constant 0 : i32
    %c0_i32_0 = arith.constant 0 : i32
    %c0_i32_1 = arith.constant 0 : i32
    return %c0_i32, %c0_i32_0, %arg0 : i32, i32, i32
  }
  func.func @transform_2(%arg0: i32, %arg1: i32) -> (i32, i32, i32) {
    %c0_i32 = arith.constant 0 : i32
    %c0_i32_0 = arith.constant 0 : i32
    return %arg1, %c0_i32, %arg0 : i32, i32, i32
  }
}

</mosaic_0001>

<bundles_post_ra>
// kernel: tpu_custom_call.1
= control target key start
LH: loop header
LB: loop body
LE: loop exit
PB: predicated region body
PF: predicated region fallthrough
CT: control target
= control target key end

     0   :  { %7 = vsyncpa [#allocation3], 0  ;;  %s232_s0 = inlined_call_operand.hbm [shape: f32[2,32,128], index: 0, kind: input, shape index: {}]   ;;  %s233_s1 = inlined_call_operand.hbm [shape: f32[1,32,512], index: 1, kind: input, shape index: {}]   ;;  %s234_s2 = inlined_call_operand.hbm [shape: f32[2,32,128], index: 2, kind: output, shape index: {}]  }
   0x1   :  { %8 = vsyncpa [#allocation6], 0 }
   0x2   :  { %9 = vsyncpa [#allocation4], 0  ;;  %s164_s9 = smov [#allocation2]   ;;  %s92_s13 = scalar_lea.hbm %s232_s0, 1024 }
   0x3   :  { %s15_s10 = sshll.u32 %s164_s9, 4  ;;  %p93_p0 = scmp.ne.s32.totalorder %s232_s0, %s92_s13  ;;  %s16_s10 = int_to_ptr.vmem [resolvable:$true] %s15_s10 }
   0x4   :  { %p96_p1 = scmp.lt.u32.totalorder %s92_s13, %s232_s0 }
   0x6   :  { %p98_p2 = pnand %p96_p1, %p93_p0 }
   0x8   :  { %101 = shalt.err (!%p98_p2)
}
   0x9   :  { %s102_s18 = scalar_lea.vmem %s16_s10, 1024  ;;  %p107_p4 = scmp.lt.s32.totalorder %s16_s10, %s16_s10 }
   0xa   :  { %p103_p3 = scmp.ne.s32.totalorder %s16_s10, %s102_s18  ;;  %p108_p5 = scmp.lt.s32.totalorder %s102_s18, %s102_s18 }
   0xc   :  { %p109_p6 = por %p108_p5, %p107_p4 }
   0xe   :  { %p110_p7 = pnand %p109_p6, %p103_p3 }
  0x10   :  { %113 = shalt.err (!%p110_p7)
}
  0x11   :  { %s165_s19 = smov 128   ;;  %s166_s20 = smov 8  }
  0x12   :  { %21 = dma.hbm_to_vmem [thread:$0]  %s232_s0, 1024, %s16_s10, [#allocation3], %s165_s19, %s165_s19, %s166_s20  }
  0x13   :  { %s167_s23 = smov [#allocation5]   ;;  %s114_s27 = scalar_lea.hbm %s233_s1, 512 }
  0x14   :  { %s27_s24 = sshll.u32 %s167_s23, 4  ;;  %p115_p8 = scmp.ne.s32.totalorder %s233_s1, %s114_s27  ;;  %s28_s24 = int_to_ptr.vmem [resolvable:$true] %s27_s24 }
  0x15   :  { %s116_s4 = scalar_lea.hbm %s233_s1, 2048  ;;  %p118_p10 = scmp.lt.u32.totalorder %s114_s27, %s233_s1 }
  0x16   :  { %p117_p9 = scmp.lt.u32.totalorder %s116_s4, %s114_s27 }
  0x18   :  { %p119_p11 = por %p118_p10, %p117_p9 }
  0x1a   :  { %p120_p12 = pnand %p119_p11, %p115_p8 }
  0x1c   :  { %123 = shalt.err (!%p120_p12)
}
  0x1d   :  { %s124_s0 = scalar_lea.vmem %s28_s24, 512  ;;  %p129_p0 = scmp.lt.s32.totalorder %s28_s24, %s28_s24 }
  0x1e   :  { %p125_p13 = scmp.ne.s32.totalorder %s28_s24, %s124_s0  ;;  %p130_p1 = scmp.lt.s32.totalorder %s124_s0, %s124_s0 }
  0x20   :  { %p131_p2 = por %p130_p1, %p129_p0 }
  0x22   :  { %p132_p3 = pnand %p131_p2, %p125_p13 }
  0x24   :  { %135 = shalt.err (!%p132_p3)
}
  0x25   :  { %s168_s7 = smov 512  }
  0x26   :  { %33 = dma.hbm_to_vmem [thread:$0]  %s233_s1, 512, %s28_s24, [#allocation6], %s168_s7, %s165_s19, %s166_s20  }
  0x27   :  { %158 = dma.done.wait [#allocation3], 1024  }
  0x28   :  { %159 = vsyncadd [#allocation3], 4294966272 }
  0x29   :  { %160 = dma.done.wait [#allocation6], 512  }
  0x2a   :  { %161 = vsyncadd [#allocation6], 4294966784  ;;  %v40_v0 = vld [vmem:[#allocation2] sm:$0xff]  ;;  %v41_v2 = vld [vmem:[#allocation2 + $0x8] sm:$0xff]  ;;  %s169_s10 = smov [#allocation7]  }
  0x2b   :  { %v48_v1 = vld [vmem:[#allocation5] sm:$0xff]  ;;  %v49_v4 = vld [vmem:[#allocation5 + $0x8] sm:$0xff]  ;;  %v42_v5 = vld [vmem:[#allocation2 + $0x10] sm:$0xff]  ;;  %s73_s11 = sshll.u32 %s169_s10, 4  ;;  %s74_s11 = int_to_ptr.vmem [resolvable:$true] %s73_s11 }
  0x2c   :  { %v52_v3 = vadd.f32 %v48_v1, %v40_v0  ;;  %v50_v6 = vld [vmem:[#allocation5 + $0x10] sm:$0xff]  ;;  %v53_v7 = vadd.f32 %v49_v4, %v41_v2  ;;  %v43_v9 = vld [vmem:[#allocation2 + $0x18] sm:$0xff]  ;;  %v44_v11 = vld [vmem:[#allocation2 + $0x20] sm:$0xff]  ;;  %s136_s1 = scalar_lea.vmem %s74_s11, 1024  ;;  %p141_p5 = scmp.lt.s32.totalorder %s74_s11, %s74_s11 }
  0x2d   :  { %v54_v8 = vadd.f32 %v50_v6, %v42_v5  ;;  %v51_v10 = vld [vmem:[#allocation5 + $0x18] sm:$0xff]  ;;  %v56_v13 = vadd.f32 %v48_v1, %v44_v11  ;;  %v45_v14 = vld [vmem:[#allocation2 + $0x28] sm:$0xff]  ;;  %v46_v15 = vld [vmem:[#allocation2 + $0x30] sm:$0xff]  ;;  %p137_p4 = scmp.ne.s32.totalorder %s74_s11, %s136_s1  ;;  %p142_p6 = scmp.lt.s32.totalorder %s136_s1, %s136_s1 }
  0x2e   :  { %60 = vst [vmem:[#allocation7] sm:$0xff] %v52_v3  ;;  %v55_v12 = vadd.f32 %v51_v10, %v43_v9  ;;  %v47_v16 = vld [vmem:[#allocation2 + $0x38] sm:$0xff]  ;;  %61 = vst [vmem:[#allocation7 + $0x8] sm:$0xff] %v53_v7  ;;  %v57_v17 = vadd.f32 %v49_v4, %v45_v14  ;;  %v58_v18 = vadd.f32 %v50_v6, %v46_v15 }
  0x2f   :  { %62 = vst [vmem:[#allocation7 + $0x10] sm:$0xff] %v54_v8  ;;  %v59_v19 = vadd.f32 %v51_v10, %v47_v16  ;;  %64 = vst [vmem:[#allocation7 + $0x20] sm:$0xff] %v56_v13  ;;  %p143_p7 = por %p142_p6, %p141_p5 }
  0x30   :  { %63 = vst [vmem:[#allocation7 + $0x18] sm:$0xff] %v55_v12  ;;  %65 = vst [vmem:[#allocation7 + $0x28] sm:$0xff] %v57_v17 }
  0x31   :  { %66 = vst [vmem:[#allocation7 + $0x30] sm:$0xff] %v58_v18  ;;  %67 = vst [vmem:[#allocation7 + $0x38] sm:$0xff] %v59_v19  ;;  %p144_p8 = pnand %p143_p7, %p137_p4 }
  0x33   :  { %147 = shalt.err (!%p144_p8)
}
  0x34   :  { %s148_s14 = scalar_lea.hbm %s234_s2, 1024 }
  0x35   :  { %p149_p9 = scmp.ne.s32.totalorder %s234_s2, %s148_s14  ;;  %p152_p10 = scmp.lt.u32.totalorder %s148_s14, %s234_s2 }
  0x37   :  { %p154_p11 = pnand %p152_p10, %p149_p9 }
  0x39   :  { %157 = shalt.err (!%p154_p11)
}
  0x3a   :  { %79 = dma.vmem_to_hbm [thread:$0]  %s74_s11, 1024, %s234_s2, [#allocation4], %s165_s19, %s165_s19, %s166_s20  }
  0x3b   :  { %162 = dma.done.wait [#allocation4], 1024  }
  0x3c   :  { %163 = vsyncadd [#allocation4], 4294966272 }
  0x3d   :  { %83 = vsyncpa [#allocation3], 1 }
  0x3e   :  { %84 = vsyncpa [#allocation6], 1 }
  0x3f   :  { %85 = vsyncpa [#allocation4], 1 }

</bundles_post_ra>
